<compile_context>
chip_gen: v5e
topology: v5e:2x2
jax: 0.10.0
libtpu: 0.0.40
codegen_flags: <defaults>
</compile_context>

<pallas_src>
import jax
import jax.numpy as jnp
from jax.experimental import pallas as pl
from jax.experimental.pallas import tpu as pltpu


def _round_up(v: int, m: int) -> int:
    return ((v + m - 1) // m) * m


def _bilinear_kernel(x_ref, y_ref, wcc_ref, wrow_ref, wbb_ref,
                     o_ref, t_scr, rb_scr):
    # Grid: (n_out, batch_tiles, SX_tiles, SY_tiles); SY is innermost.
    # x_ref:    (Bt, TSX, D)
    # y_ref:    (Bt, TSY, D)
    # wcc_ref:  (1, D, D)   core weight block for this n_out index
    # wrow_ref: (1, 2, D)   row 0 = last column (x-side), row 1 = last row (y-side)
    # wbb_ref:  (1, 1, 1)   corner term
    # o_ref:    (Bt, 1, TSX, TSY)
    wrow = wrow_ref[0].astype(jnp.float32)                # (2, D)
    wcb = wrow[0:1]                                       # (1, D)
    wbc = wrow[1:2]                                       # (1, D)

    # Hoist t = x @ W_cc (and the x-side rank-1 bias term) across SY tiles:
    # recompute only on the first SY tile for the current (out, batch, SX).
    @pl.when(pl.program_id(3) == 0)
    def _():
        x = x_ref[...]                                    # (Bt, TSX, D)
        bt, tsx, d = x.shape
        # One tall MXU matmul (bt*tsx rows) instead of bt small ones.
        t = jnp.dot(x.reshape(bt * tsx, d), wcc_ref[0],
                    preferred_element_type=jnp.float32)
        t_scr[...] = t.reshape(bt, tsx, -1).astype(t_scr.dtype)
        rb_scr[...] = jnp.sum(x.astype(jnp.float32) * wcb,
                              axis=-1, keepdims=True)     # (Bt, TSX, 1)

    y = y_ref[...]                                        # (Bt, TSY, D)
    # Transposed-RHS contraction: MXU consumes y in its native layout (no y.T).
    s = jnp.einsum('bxd,byd->bxy', t_scr[...], y,
                   preferred_element_type=jnp.float32)    # (Bt, TSX, TSY)

    cb = jnp.sum(y.astype(jnp.float32) * wbc, axis=-1)    # (Bt, TSY)
    s = s + rb_scr[...] + cb[:, None, :] + wbb_ref[...].astype(jnp.float32)
    o_ref[:, 0] = s.astype(o_ref.dtype)


def partition_weight(weight, n_in, bias_x, bias_y):
    """Split the (n_out, n_in+bx, n_in+by) weight into kernel operands.

    Call this once per parameter update and reuse the result to keep the
    slicing out of the per-forward path.
    """
    n_out = weight.shape[0]
    w_cc = weight[:, :n_in, :n_in]                                 # (n_out,D,D)
    w_cb = (weight[:, :n_in, n_in] if bias_y
            else jnp.zeros((n_out, n_in), weight.dtype))           # x-side
    w_bc = (weight[:, n_in, :n_in] if bias_x
            else jnp.zeros((n_out, n_in), weight.dtype))           # y-side
    w_row = jnp.stack([w_cb, w_bc], axis=1)                        # (n_out,2,D)
    if bias_x and bias_y:
        w_bb = weight[:, n_in, n_in].reshape(n_out, 1, 1)
    else:
        w_bb = jnp.zeros((n_out, 1, 1), weight.dtype)
    return w_cc, w_row, w_bb


def bilinear_forward(x, y, weight, *, bias_x=True, bias_y=True):
    """Pallas implementation of BiLinear.forward.

    x: (B, SX, n_in), y: (B, SY, n_in)
    weight: (n_out, n_in + bias_x, n_in + bias_y)
    Returns (B, SX, SY) if n_out == 1 else (B, n_out, SX, SY).
    """
    B, SX, n_in = x.shape
    By, SY, n_in_y = y.shape
    assert By == B and n_in_y == n_in and x.dtype == y.dtype
    n_out = weight.shape[0]
    assert weight.shape == (n_out, n_in + int(bias_x), n_in + int(bias_y))

    w_cc, w_row, w_bb = partition_weight(weight, n_in, bias_x, bias_y)

    # --- per-generation VMEM budget -------------------------------------
    try:
        vmem_cap = int(pltpu.get_tpu_info().vmem_capacity_bytes)
    except Exception:
        vmem_cap = 64 * 1024 * 1024          # conservative (v7x-sized) default
    big_vmem = vmem_cap >= 100 * 1024 * 1024  # v5e / v6e: 128 MiB

    # --- tile selection: fixed preferred tiles + padded edge blocks ------
    pref_tsx = 256
    pref_tsy = 512 if big_vmem else 256       # lane-dense output stores
    tsx = SX if SX <= pref_tsx else pref_tsx
    tsy = SY if SY <= pref_tsy else pref_tsy
    sx_pad = _round_up(SX, tsx)
    sy_pad = _round_up(SY, tsy)

    itemsize = jnp.dtype(x.dtype).itemsize
    w_itemsize = jnp.dtype(weight.dtype).itemsize
    # Per-unit-of-bt VMEM bytes: double-buffered x / y / out blocks + scratch.
    per_b = (2 * (tsx * n_in + tsy * n_in + tsx * tsy) * itemsize
             + tsx * n_in * itemsize          # t_scr (input dtype)
             + tsx * 4)                       # rb_scr (f32)
    w_bytes = (n_in * n_in + 2 * n_in + 1) * w_itemsize   # single-buffered
    budget = min(vmem_cap // 2, 48 * 1024 * 1024)
    bt_max = max(1, (budget - w_bytes) // per_b)

    # Fold batch into one grid step only for tiny problems, bounded by VMEM.
    tiny = (sx_pad == tsx and sy_pad == tsy and tsx * tsy <= 128 * 128)
    bt = int(min(B, bt_max)) if tiny else 1
    # v7x has 2 TensorCores sharded over parallel axes: keep >= 2 blocks on a
    # parallel axis when everything else would fold to a single block.
    if n_out == 1 and sx_pad == tsx and B >= 2:
        bt = min(bt, B // 2)
    bt = max(bt, 1)
    while B % bt:
        bt -= 1

    # --- pad SX / SY to tile multiples (edge blocks are sliced off below) -
    if sx_pad != SX:
        x = jnp.pad(x, ((0, 0), (0, sx_pad - SX), (0, 0)))
    if sy_pad != SY:
        y = jnp.pad(y, ((0, 0), (0, sy_pad - SY), (0, 0)))

    grid = (n_out, B // bt, sx_pad // tsx, sy_pad // tsy)

    footprint = bt * per_b + w_bytes + (1 << 20)
    hi = (vmem_cap * 3) // 4 if big_vmem else vmem_cap // 2
    vmem_limit = int(max(min(2 * footprint, hi), min(32 * 1024 * 1024, hi)))

    out = pl.pallas_call(
        _bilinear_kernel,
        out_shape=jax.ShapeDtypeStruct((B, n_out, sx_pad, sy_pad), x.dtype),
        grid_spec=pltpu.PrefetchScalarGridSpec(
            num_scalar_prefetch=0,
            grid=grid,
            in_specs=[
                pl.BlockSpec((bt, tsx, n_in), lambda o, b, i, j: (b, i, 0)),
                pl.BlockSpec((bt, tsy, n_in), lambda o, b, i, j: (b, j, 0)),
                # Weight blocks only change with the outermost n_out axis:
                # single-buffer them to save VMEM (no pipelining benefit).
                pl.BlockSpec((1, n_in, n_in), lambda o, b, i, j: (o, 0, 0),
                             pipeline_mode=pl.Buffered(1)),
                pl.BlockSpec((1, 2, n_in), lambda o, b, i, j: (o, 0, 0),
                             pipeline_mode=pl.Buffered(1)),
                pl.BlockSpec((1, 1, 1), lambda o, b, i, j: (o, 0, 0)),
            ],
            out_specs=pl.BlockSpec((bt, 1, tsx, tsy),
                                   lambda o, b, i, j: (b, o, i, j)),
            scratch_shapes=[
                pltpu.VMEM((bt, tsx, n_in), x.dtype),   # t = x @ W_cc
                pltpu.VMEM((bt, tsx, 1), jnp.float32),  # x . w_cb
            ],
        ),
        compiler_params=pltpu.CompilerParams(
            dimension_semantics=("parallel", "parallel", "parallel",
                                 "arbitrary"),
            vmem_limit_bytes=vmem_limit,
        ),
    )(x, y, w_cc, w_row, w_bb)

    out = out[:, :, :SX, :SY]   # drop padded rows / cols
    if n_out == 1:
        out = out[:, 0]         # torch .squeeze(1) with size-1 dim
    return out


def _reference(x, y, weight, *, bias_x, bias_y):
    x_aug = jnp.concatenate([x, jnp.ones_like(x[..., :1])], -1) if bias_x else x
    y_aug = jnp.concatenate([y, jnp.ones_like(y[..., :1])], -1) if bias_y else y
    s = jnp.einsum('bxi,oij,byj->boxy', x_aug, weight, y_aug)
    if weight.shape[0] == 1:
        s = s[:, 0]
    return s


if __name__ == "__main__":
    key = jax.random.PRNGKey(0)

    configs = [
        dict(B=2, SX=8, SY=16, N_IN=32, N_OUT=1, bias_x=True, bias_y=True),
        dict(B=2, SX=16, SY=8, N_IN=24, N_OUT=2, bias_x=True, bias_y=False),
        dict(B=2, SX=8, SY=8, N_IN=16, N_OUT=2, bias_x=False, bias_y=True),
    ]

    for cfg in configs:
        key, kx, ky, kw = jax.random.split(key, 4)
        B, SX, SY = cfg["B"], cfg["SX"], cfg["SY"]
        n_in, n_out = cfg["N_IN"], cfg["N_OUT"]
        bias_x, bias_y = cfg["bias_x"], cfg["bias_y"]

        x = jax.random.normal(kx, (B, SX, n_in), dtype=jnp.float32)
        y = jax.random.normal(ky, (B, SY, n_in), dtype=jnp.float32)
        # NOTE: the module's reset_parameters() zeros the weight; we use a
        # deterministic nonzero weight of the same shape so the kernel compute
        # is actually exercised.
        weight = 0.02 * jax.random.normal(
            kw, (n_out, n_in + int(bias_x), n_in + int(bias_y)),
            dtype=jnp.float32)

        out = bilinear_forward(x, y, weight, bias_x=bias_x, bias_y=bias_y)
        out = jax.block_until_ready(out)

        ref = _reference(x, y, weight, bias_x=bias_x, bias_y=bias_y)
        assert out.shape == ref.shape, (out.shape, ref.shape)
        assert jnp.allclose(out, ref, atol=1e-4, rtol=1e-4), \
            f"mismatch vs reference for config {cfg}"

    print("KERNEL_OK")
</pallas_src>

<mosaic_0001>
module attributes {stable_mosaic.version = 11 : i64} {
  func.func @_bilinear_kernel(%arg0: i32, %arg1: i32, %arg2: i32, %arg3: i32, %arg4: memref<1x8x32xf32, #tpu.memory_space<vmem>>, %arg5: memref<1x16x32xf32, #tpu.memory_space<vmem>>, %arg6: memref<1x32x32xf32, #tpu.memory_space<vmem>>, %arg7: memref<1x2x32xf32, #tpu.memory_space<vmem>>, %arg8: memref<1x1x1xf32, #tpu.memory_space<vmem>>, %arg9: memref<1x1x8x16xf32, #tpu.memory_space<vmem>>, %arg10: memref<1x8x32xf32, #tpu.memory_space<vmem>>, %arg11: memref<1x8x1xf32, #tpu.memory_space<vmem>>) attributes {dimension_semantics = [#tpu.dimension_semantics<parallel>, #tpu.dimension_semantics<parallel>, #tpu.dimension_semantics<parallel>, #tpu.dimension_semantics<arbitrary>], iteration_bounds = array<i64: 1, 2, 1, 1>, scalar_prefetch = 0 : i64, scratch_operands = 2 : i64, tpu.core_type = #tpu.core_type<tc>, window_params = [{transform_indices = @transform_0, window_bounds = array<i64: 1, 8, 32>}, {transform_indices = @transform_1, window_bounds = array<i64: 1, 16, 32>}, {pipeline_mode = #tpu.pipeline_mode<synchronous>, transform_indices = @transform_2, window_bounds = array<i64: 1, 32, 32>}, {pipeline_mode = #tpu.pipeline_mode<synchronous>, transform_indices = @transform_3, window_bounds = array<i64: 1, 2, 32>}, {transform_indices = @transform_4, window_bounds = array<i64: 1, 1, 1>}, {transform_indices = @transform_5, window_bounds = array<i64: 1, 1, 8, 16>}]} {
    %c0 = arith.constant 0 : index
    %c0_0 = arith.constant 0 : index
    %c0_1 = arith.constant 0 : index
    %0 = vector.load %arg7[%c0, %c0_0, %c0_1] : memref<1x2x32xf32, #tpu.memory_space<vmem>>, vector<1x2x32xf32>
    %1 = vector.shape_cast %0 : vector<1x2x32xf32> to vector<2x32xf32>
    %2 = vector.extract_strided_slice %1 {offsets = [0, 0], sizes = [1, 32], strides = [1, 1]} : vector<2x32xf32> to vector<1x32xf32>
    %3 = vector.extract_strided_slice %1 {offsets = [1, 0], sizes = [1, 32], strides = [1, 1]} : vector<2x32xf32> to vector<1x32xf32>
    %c0_i32 = arith.constant 0 : i32
    %4 = arith.cmpi eq, %arg3, %c0_i32 : i32
    %5 = arith.extui %4 : i1 to i32
    %c0_i32_2 = arith.constant 0 : i32
    %6 = arith.cmpi ne, %5, %c0_i32_2 : i32
    scf.if %6 {
      %c0_20 = arith.constant 0 : index
      %c0_21 = arith.constant 0 : index
      %c0_22 = arith.constant 0 : index
      %26 = vector.load %arg4[%c0_20, %c0_21, %c0_22] : memref<1x8x32xf32, #tpu.memory_space<vmem>>, vector<1x8x32xf32>
      %27 = vector.shape_cast %26 : vector<1x8x32xf32> to vector<8x32xf32>
      %c0_23 = arith.constant 0 : index
      %c0_24 = arith.constant 0 : index
      %c0_25 = arith.constant 0 : index
      %28 = vector.load %arg6[%c0_23, %c0_24, %c0_25] : memref<1x32x32xf32, #tpu.memory_space<vmem>>, vector<1x32x32xf32>
      %29 = vector.shape_cast %28 : vector<1x32x32xf32> to vector<32x32xf32>
      %cst_26 = arith.constant dense<0.000000e+00> : vector<8x32xf32>
      %30 = tpu.matmul %27, %29, %cst_26 {dimension_numbers = #tpu.dot_dimension_numbers<[1], [0], [0], [1], [0, 0, 1, 1], [], []>} : vector<8x32xf32>, vector<32x32xf32>, vector<8x32xf32> -> vector<8x32xf32>
      %31 = vector.shape_cast %30 : vector<8x32xf32> to vector<1x8x32xf32>
      %c0_27 = arith.constant 0 : index
      %c0_28 = arith.constant 0 : index
      %c0_29 = arith.constant 0 : index
      %32 = vector.load %arg10[%c0_27, %c0_28, %c0_29] : memref<1x8x32xf32, #tpu.memory_space<vmem>>, vector<1x8x32xf32>
      tpu.vector_store %arg10[%c0_27, %c0_28, %c0_29], %31 {strides = array<i32>} : memref<1x8x32xf32, #tpu.memory_space<vmem>>, vector<1x8x32xf32>,
      %33 = vector.shape_cast %2 : vector<1x32xf32> to vector<1x1x32xf32>
      %34 = vector.broadcast %33 : vector<1x1x32xf32> to vector<1x8x32xf32>
      %35 = arith.mulf %26, %34 : vector<1x8x32xf32>
      %cst_30 = arith.constant dense<0.000000e+00> : vector<1x8xf32>
      %36 = vector.multi_reduction <add>, %35, %cst_30 [2] : vector<1x8x32xf32> to vector<1x8xf32>
      %37 = vector.shape_cast %36 : vector<1x8xf32> to vector<1x8x1xf32>
      %c0_31 = arith.constant 0 : index
      %c0_32 = arith.constant 0 : index
      %c0_33 = arith.constant 0 : index
      %38 = vector.load %arg11[%c0_31, %c0_32, %c0_33] : memref<1x8x1xf32, #tpu.memory_space<vmem>>, vector<1x8x1xf32>
      tpu.vector_store %arg11[%c0_31, %c0_32, %c0_33], %37 {strides = array<i32>} : memref<1x8x1xf32, #tpu.memory_space<vmem>>, vector<1x8x1xf32>,
    } else {
    }
    %c0_3 = arith.constant 0 : index
    %c0_4 = arith.constant 0 : index
    %c0_5 = arith.constant 0 : index
    %7 = vector.load %arg5[%c0_3, %c0_4, %c0_5] : memref<1x16x32xf32, #tpu.memory_space<vmem>>, vector<1x16x32xf32>
    %c0_6 = arith.constant 0 : index
    %c0_7 = arith.constant 0 : index
    %c0_8 = arith.constant 0 : index
    %8 = vector.load %arg10[%c0_6, %c0_7, %c0_8] : memref<1x8x32xf32, #tpu.memory_space<vmem>>, vector<1x8x32xf32>
    "tpu.trace_start"() <{level = 10 : i32, message = "bxd,byd->bxy"}> : () -> ()
    %cst = arith.constant dense<0.000000e+00> : vector<1x8x16xf32>
    %9 = tpu.matmul %8, %7, %cst {dimension_numbers = #tpu.dot_dimension_numbers<[2], [2], [1], [1], [0, 0, 0, 1, 1, 1], [0], [0]>} : vector<1x8x32xf32>, vector<1x16x32xf32>, vector<1x8x16xf32> -> vector<1x8x16xf32>
    "tpu.trace_stop"() : () -> ()
    %10 = vector.shape_cast %3 : vector<1x32xf32> to vector<1x1x32xf32>
    %11 = vector.broadcast %10 : vector<1x1x32xf32> to vector<1x16x32xf32>
    %12 = arith.mulf %7, %11 : vector<1x16x32xf32>
    %cst_9 = arith.constant dense<0.000000e+00> : vector<1x16xf32>
    %13 = vector.multi_reduction <add>, %12, %cst_9 [2] : vector<1x16x32xf32> to vector<1x16xf32>
    %c0_10 = arith.constant 0 : index
    %c0_11 = arith.constant 0 : index
    %c0_12 = arith.constant 0 : index
    %14 = vector.load %arg11[%c0_10, %c0_11, %c0_12] : memref<1x8x1xf32, #tpu.memory_space<vmem>>, vector<1x8x1xf32>
    %15 = vector.broadcast %14 : vector<1x8x1xf32> to vector<1x8x16xf32>
    %16 = arith.addf %9, %15 : vector<1x8x16xf32>
    %17 = vector.shape_cast %13 : vector<1x16xf32> to vector<1x1x16xf32>
    %18 = vector.broadcast %17 : vector<1x1x16xf32> to vector<1x8x16xf32>
    %19 = arith.addf %16, %18 : vector<1x8x16xf32>
    %c0_13 = arith.constant 0 : index
    %c0_14 = arith.constant 0 : index
    %c0_15 = arith.constant 0 : index
    %20 = vector.load %arg8[%c0_13, %c0_14, %c0_15] : memref<1x1x1xf32, #tpu.memory_space<vmem>>, vector<1x1x1xf32>
    %21 = vector.broadcast %20 : vector<1x1x1xf32> to vector<1x8x16xf32>
    %22 = arith.addf %19, %21 : vector<1x8x16xf32>
    %c0_16 = arith.constant 0 : index
    %c0_17 = arith.constant 0 : index
    %c0_18 = arith.constant 0 : index
    %c0_19 = arith.constant 0 : index
    %23 = vector.load %arg9[%c0_16, %c0_17, %c0_18, %c0_19] : memref<1x1x8x16xf32, #tpu.memory_space<vmem>>, vector<1x1x8x16xf32>
    %24 = vector.shape_cast %23 : vector<1x1x8x16xf32> to vector<1x8x16xf32>
    %25 = vector.shape_cast %22 : vector<1x8x16xf32> to vector<1x1x8x16xf32>
    tpu.vector_store %arg9[%c0_16, %c0_17, %c0_18, %c0_19], %25 {strides = array<i32>} : memref<1x1x8x16xf32, #tpu.memory_space<vmem>>, vector<1x1x8x16xf32>,
    return
  }
  func.func @transform_0(%arg0: i32, %arg1: i32, %arg2: i32, %arg3: i32) -> (i32, i32, i32) {
    %c0_i32 = arith.constant 0 : i32
    %c0_i32_0 = arith.constant 0 : i32
    return %arg1, %arg2, %c0_i32 : i32, i32, i32
  }
  func.func @transform_1(%arg0: i32, %arg1: i32, %arg2: i32, %arg3: i32) -> (i32, i32, i32) {
    %c0_i32 = arith.constant 0 : i32
    %c0_i32_0 = arith.constant 0 : i32
    return %arg1, %arg3, %c0_i32 : i32, i32, i32
  }
  func.func @transform_2(%arg0: i32, %arg1: i32, %arg2: i32, %arg3: i32) -> (i32, i32, i32) {
    %c0_i32 = arith.constant 0 : i32
    %c0_i32_0 = arith.constant 0 : i32
    %c0_i32_1 = arith.constant 0 : i32
    return %arg0, %c0_i32, %c0_i32_0 : i32, i32, i32
  }
  func.func @transform_3(%arg0: i32, %arg1: i32, %arg2: i32, %arg3: i32) -> (i32, i32, i32) {
    %c0_i32 = arith.constant 0 : i32
    %c0_i32_0 = arith.constant 0 : i32
    %c0_i32_1 = arith.constant 0 : i32
    return %arg0, %c0_i32, %c0_i32_0 : i32, i32, i32
  }
  func.func @transform_4(%arg0: i32, %arg1: i32, %arg2: i32, %arg3: i32) -> (i32, i32, i32) {
    %c0_i32 = arith.constant 0 : i32
    %c0_i32_0 = arith.constant 0 : i32
    %c0_i32_1 = arith.constant 0 : i32
    return %arg0, %c0_i32, %c0_i32_0 : i32, i32, i32
  }
  func.func @transform_5(%arg0: i32, %arg1: i32, %arg2: i32, %arg3: i32) -> (i32, i32, i32, i32) {
    %c0_i32 = arith.constant 0 : i32
    return %arg1, %arg0, %arg2, %arg3 : i32, i32, i32, i32
  }
}

</mosaic_0001>

<bundles_post_ra>
// kernel: tpu_custom_call.1
= control target key start
LH: loop header
LB: loop body
LE: loop exit
PB: predicated region body
PF: predicated region fallthrough
CT: control target
= control target key end

     0   :  { %s1180_s0 = inlined_call_operand.hbm [shape: f32[2,8,32], index: 0, kind: input, shape index: {}]   ;;  %s1181_s1 = inlined_call_operand.hbm [shape: f32[2,16,32], index: 1, kind: input, shape index: {}]   ;;  %s1182_s2 = inlined_call_operand.hbm [shape: f32[1,32,32], index: 2, kind: input, shape index: {}]   ;;  %s1183_s3 = inlined_call_operand.vmem [shape: f32[1,2,32], index: 3, kind: input, shape index: {}]   ;;  %s1184_s4 = inlined_call_operand.<no memory space> [shape: f32[1,1,1], index: 4, kind: input, shape index: {}]   ;;  %s1185_s5 = inlined_call_operand.hbm [shape: f32[2,1,8,16], index: 5, kind: output, shape index: {}]  }
   0x1   :  { %1191 = sst [smem:[#allocation20_spill]] %s1182_s2  ;;  %v10_v0 = vstv %s1184_s4 }
   0x2   :  { %11 = vst [vmem:[#allocation4] sm:$0x1] %v10_v0 }
   0x3   :  { %12 = vsyncpa [#allocation6], 0 }
   0x4   :  { %14 = vsyncpa [#allocation6 + $0x1], 0 }
   0x5   :  { %15 = vsyncpa [#allocation9], 0 }
   0x6   :  { %17 = vsyncpa [#allocation9 + $0x1], 0 }
   0x7   :  { %18 = vsyncpa [#allocation7], 0 }
   0x8   :  { %20 = vsyncpa [#allocation7 + $0x1], 0  ;;  %s1005_s20 = smov 0   ;;  %s1007_s21 = smov 0  }
   0x9   :  { %s1009_s22 = smov 0   ;;  %s1011_s23 = smov 0  }
   0xa   :  { %s1013_s24 = smov 0   ;;  %s1015_s25 = smov 0  }
   0xb LB: > { %1192 = sst [smem:[#allocation16_spill]] %s954_s22  ;;  %s1036_s4 = sadd.s32 4294967295, %s966_s25   ;;  %s966_s25 = sphi %s1015_s25, %s26_s25   ;;  %s962_s24 = sphi %s1013_s24, %s1211_s24   ;;  %s958_s23 = sphi %s1011_s23, %s1210_s23   ;;  %s954_s22 = sphi %s1009_s22, %s1206_s22   ;;  %s950_s21 = sphi %s1007_s21, %s1209_s21   ;;  %s946_s20 = sphi %s1005_s20, %s1208_s20  }
   0xc   : > { %p677_p0 = scmp.ge.s32.totalorder %s966_s25, 1  ;;  %p75_p1 = scmp.eq.s32.totalorder %s1036_s4, 0 }
   0xd   : > { %p223_p2 = scmp.lt.s32.totalorder %s966_s25, 3  ;;  %s1193_s2 = sld [smem:[#allocation20_spill]] }
   0xe   : > { %s968_s30 = smov [#allocation10]   ;;  %p681_p6 = scmp.ge.s32.totalorder %s966_s25, 2 }
   0xf   : > { %p1044_p3 = pnand %p677_p0, %p223_p2  ;;  %s239_s6 = sshll.u32 %s968_s30, 4  ;;  %s240_s6 = int_to_ptr.vmem [resolvable:$true] %s239_s6 }
  0x10   : > { %s1186_s7 = smov 128   ;;  %s1187_s8 = smov 8  }
  0x11   : > { %p711_p4 = pneg %p1044_p3  ;;  %s676_s9 = sadd.s32 4294967294, %s966_s25  }
  0x12   : > { %s48_s10 = sadd.s32 1, %s962_s24  ;;  %s61_s11 = sadd.s32 1, %s954_s22 }
  0x13   : > { %s237_s28 = sshll.u32 %s1193_s2, 4  ;;  %p712_p5 = pnand %p711_p4, %p75_p1  ;;  %s238_s28 = int_to_ptr.hbm [resolvable:$true] %s237_s28 }
  0x14   : > { %p50_p7 = scmp.ge.s32.totalorder %s48_s10, 2  ;;  %p68_p8 = scmp.ne.s32.totalorder %s954_s22, %s950_s21 }
  0x15   : > { %714 = dma.hbm_to_vmem [thread:$0]  (!%p712_p5), %s238_s28, 512, %s240_s6, [#allocation9], %s1186_s7, %s1186_s7, %s1187_s8  }
  0x16   : > { %p69_p9 = scmp.eq.s32.totalorder %s966_s25, 0  ;;  %p74_p10 = scmp.ne.s32.totalorder %s950_s21, %s946_s20 }
  0x17   : > { %s1213_s10 = smov (%p50_p7, %s48_s10), 0  ;;  %p210_p13 = scmp.eq.s32.totalorder %s1036_s4, 1 }
  0x18   : > { %1195 = sst [smem:[#allocation17_spill]] %s1213_s10  ;;  %p1066_p11 = por %p69_p9, %p68_p8 }
  0x19   : > { %p1072_p12 = por %p75_p1, %p74_p10  ;;  %s56_s14 = ssub.s32 %s962_s24, %s1213_s10 }
  0x1a   : > { %p59_p0 = scmp.eq.s32.totalorder %s56_s14, 0  ;;  %p216_p2 = scmp.eq.s32.totalorder %s676_s9, 1 }
  0x1b   : > { %p1079_p4 = por %p210_p13, %p68_p8  ;;  %p727_p5 = scmp.lt.s32.totalorder %s966_s25, 2 }
  0x1c   : > { %s1085_s16 = scalar_select %p59_p0, %s954_s22, %s61_s11  }
  0x1d   : > { %p1087_p7 = por %p216_p2, %p74_p10  ;;  %s266_s18 = sand.u32 1, %s954_s22  }
  0x1e   : > { %1199 = sst [smem:[#allocation18_spill]] %s1085_s16  ;;  %s682_s19 = sshll.u32 %s266_s18, 3 }
  0x1f   : > { %s1200_s17 = scalar_select %p1087_p7, 1, 0 }
  0x20   : > { %s683_s26 = sshll.u32 %s962_s24, 3  ;;  %s270_s6 = scalar_lea.vmem [#allocation5], %s682_s19 }
  0x21   : > { %1201 = sst [smem:[#allocation19_spill]] %s1200_s17  ;;  %s275_s30 = scalar_lea.hbm %s1180_s0, %s683_s26 }
  0x22   : > { %s279_s9 = sshll.u32 %s270_s6, 4  ;;  %s277_s14 = sshll.u32 %s275_s30, 4  ;;  %s280_s9 = int_to_ptr.vmem [resolvable:$true] %s279_s9  ;;  %s278_s14 = int_to_ptr.hbm [resolvable:$true] %s277_s14 }
  0x23   : > { %p716_p8 = pnand %p727_p5, %p1066_p11  ;;  %s684_s11 = sshll.u32 %s266_s18, 4 }
  0x24   : > { %s700_s7 = sshll.u32 %s962_s24, 4  ;;  %s267_s8 = scalar_lea.sflag [#allocation6], %s266_s18 }
  0x25   : > { %718 = dma.hbm_to_vmem [thread:$0]  (!%p716_p8), %s278_s14, 128, %s280_s9, %s267_s8  }
  0x26   : > { %s290_s2 = scalar_lea.vmem [#allocation8], %s684_s11  ;;  %s286_s16 = sand.u32 1, %s966_s25  }
  0x27   : > { %s300_s10 = sshll.u32 %s290_s2, 4  ;;  %s297_s27 = scalar_lea.hbm %s1181_s1, %s700_s7  ;;  %s301_s10 = int_to_ptr.vmem [resolvable:$true] %s300_s10 }
  0x28   : > { %s298_s26 = sshll.u32 %s297_s27, 4  ;;  %s287_s19 = scalar_lea.sflag [#allocation9], %s286_s16  ;;  %s299_s26 = int_to_ptr.hbm [resolvable:$true] %s298_s26 }
  0x29   : > { %s1202_s28 = smov 8   ;;  %s1203_s30 = smov 128  }
  0x2a   : > { %721 = dma.hbm_to_vmem [thread:$0]  (!%p716_p8), %s299_s26, 256, %s301_s10, %s287_s19, %s1203_s30, %s1203_s30, %s1202_s28  }
  0x2b   : > { %312 = sbr.rel (%p1044_p3) target bundleno = 331 (0x14b), region = 40  ;;  %s1109_s8 = sand.u32 (!%p1044_p3), 1, %s950_s21  }
  0x2c   : > { %s688_s2 = sshll.u32 (!%p1044_p3), %s1109_s8, 3  ;;  %s315_s22 = scalar_lea.sflag (!%p1044_p3), [#allocation6], %s1109_s8 }
  0x2d   : > { %s318_s7 = scalar_lea.vmem (!%p1044_p3), [#allocation5], %s688_s2 }
  0x30   : > { %929 = dma.done.wait (%p1072_p12), %s315_s22, 128  }
  0x31   : > { %931 = vsyncadd (%p1072_p12), %s315_s22, 4294967168  ;;  %s324_s29 = sand.u32 1, %s1036_s4   ;;  %s689_s10 = sshll.u32 %s1109_s8, 4 }
  0x32   : > { %s325_s12 = scalar_lea.sflag [#allocation9], %s324_s29  ;;  %s328_s16 = scalar_lea.vmem [#allocation8], %s689_s10 }
  0x33   : > { %933 = dma.done.wait (%p1072_p12), %s325_s12, 256  }
  0x34   : > { %935 = vsyncadd (%p1072_p12), %s325_s12, 4294967040 }
  0x35   : > { %937 = dma.done.wait (%p75_p1), [#allocation9], 512  }
  0x36   : > { %939 = vsyncadd (%p75_p1), [#allocation9], 4294966784  ;;  %v390_v1 = vld [vmem:[#allocation10 + $0x18] sm:$0xff]  ;;  %v389_v2 = vld [vmem:[#allocation10 + $0x10] sm:$0xff]  ;;  %vm391_vm0 = vcmask 261120   ;;  %v971_v18 = vmov 0   ;;  %v473_v23 = vlaneseq }
  0x37   : > { %407 = vmatpush.msra.mxu0 %v390_v1  ;;  %v381_v3 = vld [vmem:[%s1183_s3] sm:$0x3]  ;;  %v388_v4 = vld [vmem:[#allocation10 + $0x8] sm:$0xff]  ;;  %782 = vset.pattern.permute.xlu1 %v971_v18  ;;  %vm421_vm1 = vcmask 7168   ;;  %s697_s4 = sshll.u32 %s958_s23, 3  ;;  %vm478_vm2 = vcmask 130112  }
  0x38   : > { %v416_v5 = vperm.slane %v381_v3, 0  ;;  %v424_v6 = vld [vmem:[%s328_s16 + $0x8] sm:$0xff]  ;;  %v426_v7 = vperm.slane %v381_v3, 1  ;;  %v387_v9 = vld [vmem:[#allocation10] sm:$0xff]  ;;  %783 = vset.pattern.permute.xlu2 %v971_v18  ;;  %784 = vset.pattern.permute.xlu0 %v971_v18  ;;  %v474_v24 = vand.u32 127, %v473_v23  ;;  %s518_s9 = scalar_lea.hbm %s1185_s5, %s697_s4  ;;  %s372_s14 = scalar_lea.vmem [#allocation11], %s688_s2 }
  0x39   : > { %408 = vmatpush.msra.mxu0 %v389_v2  ;;  %v386_v8 = vld [vmem:[%s318_s7] sm:$0xff]  ;;  %693 = vmatpush.xpose.msk.msra.mxu1 %vm391_vm0, %v424_v6  ;;  %v423_v12 = vld [vmem:[%s328_s16] sm:$0xff]  ;;  %v785_v17 = vld [vmem:[#allocation4] ss:$0 sm:$0xff]  ;;  %s520_s11 = sshll.u32 %s372_s14, 4  ;;  %s522_s27 = sshll.u32 %s518_s9, 4  ;;  %s521_s11 = int_to_ptr.vmem [resolvable:$true] %s520_s11  ;;  %s523_s27 = int_to_ptr.hbm [resolvable:$true] %s522_s27 }
  0x3a   : > { %v417_v10 = vmul.f32 %v416_v5, %v386_v8  ;;  %v428_v11 = vmul.f32 %v426_v7, %v424_v6  ;;  %v427_v15 = vmul.f32 %v426_v7, %v423_v12  ;;  %498 = vperm.xlu2 %783, %v785_v17   ;;  %v476_v26 = vadd.s32 4294967288, %v474_v24  ;;  %s505_s23 = scalar_lea.sflag [#allocation7], %s1109_s8  ;;  %s890_s26 = sshra.s32 %s523_s27, 4  ;;  %s891_s26 = int_to_ptr.hbm [resolvable:$true] %s890_s26 }
  0x3b   : > { %409 = vmatpush.msra.mxu0 %v388_v4  ;;  %vm502_vm3 = vcmask 130048   ;;  %s892_s19 = scalar_lea.hbm %s891_s26, 8  ;;  %s896_s2 = scalar_lea.hbm %s1185_s5, 16 }
  0x3c   : > { %v418_v13 = vsel %vm391_vm0, %v417_v10, 0.0  ;;  %v433_v14 = vsel %vm391_vm0, %v428_v11, 0.0  ;;  %v430_v16 = vsel %vm391_vm0, %v427_v15, 0.0  ;;  %p893_p1 = scmp.ne.s32.totalorder %s891_s26, %s892_s19  ;;  %p897_p10 = scmp.lt.s32.totalorder %s891_s26, %s1185_s5 }
  0x3d   : > { %410 = vmatpush.msra.mxu0 %v387_v9  ;;  %419 = vadd.xlane.f32.xlu0 %v418_v13  ;;  %p898_p11 = scmp.lt.s32.totalorder %s896_s2, %s892_s19 }
  0x3e   : > { %692 = vmatmul.msk.f32.vlgmr.msra.gmra.mxu0 %vm391_vm0, %v386_v8  ;;  %434 = vadd.xlane.f32.xlu1 %v433_v14  ;;  %p894_p3 = pnand %p893_p1, %p1079_p4 }
  0x3f   : > { %694 = vmatpush.xpose.msk.msra.mxu1 %vm391_vm0, %v423_v12  ;;  %p899_p12 = por %p898_p11, %p897_p10 }
  0x40   : > { %p895_p9 = pneg %p894_p3 }
  0x42   : > { %p900_p13 = pnand %p899_p12, %p895_p9 }
  0x45   : > { %431 = vadd.xlane.f32.xlu0 %v430_v16 }
  0x94   : > { %v499_v33 = vpop.permute.xlu2 %498 }
  0xb0   : > { %v420_v19 = vpop.xlane.xlu0 %419 }
  0xb1   : > { %422 = vst.msk [vmem:[#allocation3] sm:$0xff] %vm421_vm1, %v420_v19  ;;  %v435_v25 = vpop.xlane.xlu1 %434 }
  0xb2   : > { %v477_v28 = vperm.slane %v435_v25, %v476_v26 }
  0xb8   : > { %v436_v20 = vld [vmem:[#allocation3] sm:$0xff]  ;;  %v432_v27 = vpop.xlane.xlu0 %431 }
  0xb9   : > { %439 = vperm.xlu1 %782, %v436_v20   ;;  %v475_v29 = vperm.slane %v432_v27, %v474_v24 }
  0xbb   : > { %v412_v21 = vpop.f32.mrf.mxu0  ;;  %v479_v34 = vsel %vm478_vm2, %v477_v28, %v475_v29 }
  0xbc   : > { %415 = vst.msk [vmem:[#allocation2] sm:$0xff] %vm391_vm0, %v412_v21 }
  0xc3   : > { %v425_v22 = vld [vmem:[#allocation2] sm:$0xff] }
  0xc4   : > { %695 = vmatmul.msk.f32.vlgmr.msra.gmra.mxu1 %vm391_vm0, %v425_v22 }
 0x12b   : > { %v440_v30 = vpop.permute.xlu1 %439 }
 0x141   : > { %v468_v31 = vpop.f32.mrf.mxu1 }
 0x142   : > { %v469_v32 = vadd.f32 %v468_v31, %v440_v30 }
 0x144   : > { %v493_v35 = vadd.f32 %v479_v34, %v469_v32 }
 0x146   : > { %v501_v36 = vadd.f32 %v499_v33, %v493_v35 }
 0x148   : > { %503 = vst.msk [vmem:[%s372_s14] sm:$0xff] %vm502_vm3, %v501_v36 }
 0x149   : > { %903 = shalt.err (!%p900_p13)
}
 0x14a   : > { %709 = dma.vmem_to_hbm [thread:$0]  (%p1079_p4), %s521_s11, 128, %s523_s27, %s505_s23  }
 0x14b PF: > { %s534_s29 = sand.u32 1, %s946_s20   ;;  %p723_p0 = pnand %p681_p6, %p1087_p7 }
 0x14c   : > { %s535_s10 = scalar_lea.sflag [#allocation7], %s534_s29 }
 0x14d   : > { %p724_p2 = pneg %p723_p0 }
 0x14f   : > { %941 = dma.done.wait (%p724_p2), %s535_s10, 128  }
 0x150   : > { %943 = vsyncadd (%p724_p2), %s535_s10, 4294967168  ;;  %s26_s25 = sadd.s32 1, %s966_s25   ;;  %s1205_s12 = sld [smem:[#allocation16_spill]] }
 0x151   : > { %p23_p5 = scmp.ge.s32.totalorder %s26_s25, 4   ;;  %s1206_s22 = sld [smem:[#allocation18_spill]] }
 0x152   : > { %s1207_s15 = sld [smem:[#allocation17_spill]]  ;;  %s1208_s20 = smov %s950_s21 }
 0x153   : > { %s1210_s23 = smov %s962_s24 }
 0x154   :  { %25 = sbr.rel (!%p23_p5) target bundleno = 11 (0xb), region = 113 }
 0x156   : > { %s1209_s21 = smov %s1205_s12 }
 0x158   : > { %s1211_s24 = smov %s1207_s15 }
 0x159   :  { %541 = vsyncpa [#allocation6], 1 }
 0x15a   :  { %543 = vsyncpa [#allocation6 + $0x1], 1 }
 0x15b   :  { %544 = vsyncpa [#allocation9], 1 }
 0x15c   :  { %546 = vsyncpa [#allocation9 + $0x1], 1 }
 0x15d   :  { %547 = vsyncpa [#allocation7], 1 }
 0x15e   :  { %549 = vsyncpa [#allocation7 + $0x1], 1 }

</bundles_post_ra>
